<compile_context>
chip_gen: v5e
topology: v5e:2x2
jax: 0.10.0
libtpu: 0.0.40
codegen_flags: <defaults>
</compile_context>

<pallas_src>
import jax
import jax.numpy as jnp
from jax.experimental import pallas as pl
from jax.experimental.pallas import tpu as pltpu


IN_FEATURES = 5 * 8     # 40
HIDDEN = 128
OUT_FEATURES = 10
MAX_TB = 2048           # batch tile cap: multiple of 256 (v6e/v7x MXU) and 128 (v5e MXU)


def _round_up(n, m):
    return ((n + m - 1) // m) * m


def _mlp_kernel(x_ref, w1_ref, b1_ref, w2_ref, b2_ref, w3_ref, b3_ref, o_ref):
    # x_ref: (TB, 40) f32       w1: (40, 128) bf16   w2: (128, 128) bf16
    # w3: (128, 128) bf16 (zero-padded past column 10)
    # b1/b2/b3: (1, 128) f32    o_ref: (TB, 10) f32
    x = x_ref[...].astype(jnp.bfloat16)                                  # in-kernel cast (VPU)
    h1 = jnp.dot(x, w1_ref[...], preferred_element_type=jnp.float32)
    h1 = jnp.maximum(h1 + b1_ref[...], 0.0)                              # f32 VPU
    h2 = jnp.dot(h1.astype(jnp.bfloat16), w2_ref[...],
                 preferred_element_type=jnp.float32)
    h2 = jnp.maximum(h2 + b2_ref[...], 0.0)                              # f32 VPU
    out = jnp.dot(h2.astype(jnp.bfloat16), w3_ref[...],
                  preferred_element_type=jnp.float32)
    out = out + b3_ref[...]
    o_ref[...] = out[:, :OUT_FEATURES].astype(o_ref.dtype)               # narrow store


def prepare_params(params):
    """One-time weight prep (hoisted out of the per-call forward)."""
    w1, b1, w2, b2, w3, b3 = params
    w1b = w1.astype(jnp.bfloat16)                                  # (40, 128)
    w2b = w2.astype(jnp.bfloat16)                                  # (128, 128)
    w3p = (jnp.zeros((HIDDEN, HIDDEN), jnp.float32)
           .at[:, :OUT_FEATURES].set(w3).astype(jnp.bfloat16))     # (128, 128)
    b3p = jnp.zeros((1, HIDDEN), jnp.float32).at[:, :OUT_FEATURES].set(b3)
    return (w1b, b1, w2b, b2, w3p, b3p)


def my_basis_function_forward(x, prepped_params):
    """x: (B, 5, 8) float32 -> (B, 10) float32."""
    w1b, b1, w2b, b2, w3p, b3p = prepped_params
    B = x.shape[0]

    # nn.Flatten: row-major reshape only (metadata-free), keep f32 for the DMA.
    x_flat = x.reshape(B, -1)

    # Batch tiling: pad to 8 sublanes, cap tile at MAX_TB, and split into >=2
    # tiles whenever possible so both v7x TensorCores get work.
    b8 = _round_up(max(B, 1), 8)
    n_tiles = max(pl.cdiv(b8, MAX_TB), 2 if b8 > 8 else 1)
    TB = min(MAX_TB, _round_up(pl.cdiv(b8, n_tiles), 8))
    B_pad = _round_up(b8, TB)
    if B_pad != B:
        x_flat = jnp.pad(x_flat, ((0, B_pad - B), (0, 0)))

    grid = (B_pad // TB,)
    const = lambda shape: pl.BlockSpec(shape, lambda i: (0,) * len(shape))

    flops = 2 * B_pad * (IN_FEATURES * HIDDEN + HIDDEN * HIDDEN + HIDDEN * HIDDEN)
    bytes_accessed = (
        B_pad * IN_FEATURES * 4                               # x (f32, read once in-kernel)
        + (IN_FEATURES * HIDDEN + 2 * HIDDEN * HIDDEN) * 2    # weights (bf16, single fetch)
        + 3 * HIDDEN * 4                                      # biases (f32)
        + B_pad * OUT_FEATURES * 4                            # narrow output (f32)
    )

    out_padded = pl.pallas_call(
        _mlp_kernel,
        out_shape=jax.ShapeDtypeStruct((B_pad, OUT_FEATURES), jnp.float32),
        grid=grid,
        in_specs=[
            pl.BlockSpec((TB, IN_FEATURES), lambda i: (i, 0)),   # x tile (f32)
            const((IN_FEATURES, HIDDEN)),                        # w1 (bf16)
            const((1, HIDDEN)),                                  # b1
            const((HIDDEN, HIDDEN)),                             # w2 (bf16)
            const((1, HIDDEN)),                                  # b2
            const((HIDDEN, HIDDEN)),                             # w3 (bf16, padded)
            const((1, HIDDEN)),                                  # b3 (padded)
        ],
        out_specs=pl.BlockSpec((TB, OUT_FEATURES), lambda i: (i, 0)),
        compiler_params=pltpu.CompilerParams(
            dimension_semantics=("parallel",),
            vmem_limit_bytes=32 * 1024 * 1024,
        ),
        cost_estimate=pl.CostEstimate(
            flops=flops, transcendentals=0, bytes_accessed=bytes_accessed),
    )(x_flat, w1b, b1, w2b, b2, w3p, b3p)

    return out_padded[:B]


def init_params(key):
    """Deterministic synthetic init (shapes mirror the PyTorch module)."""
    k1, k2, k3, k4, k5, k6 = jax.random.split(key, 6)

    def uinit(k, shape, fan_in):
        bound = 1.0 / jnp.sqrt(fan_in)
        return jax.random.uniform(k, shape, jnp.float32, -bound, bound)

    w1 = uinit(k1, (IN_FEATURES, HIDDEN), IN_FEATURES)     # (40, 128)
    b1 = uinit(k2, (1, HIDDEN), IN_FEATURES)               # (1, 128)
    w2 = uinit(k3, (HIDDEN, HIDDEN), HIDDEN)               # (128, 128)
    b2 = uinit(k4, (1, HIDDEN), HIDDEN)                    # (1, 128)
    w3 = uinit(k5, (HIDDEN, OUT_FEATURES), HIDDEN)         # (128, 10)
    b3 = uinit(k6, (1, OUT_FEATURES), HIDDEN)               # (1, 10)
    return (w1, b1, w2, b2, w3, b3)


def _reference(x, params):
    """Reference with the same bf16-operand / f32-accumulate numerics."""
    w1, b1, w2, b2, w3, b3 = params
    h = x.reshape(x.shape[0], -1).astype(jnp.bfloat16)
    h = jnp.maximum(
        jnp.dot(h, w1.astype(jnp.bfloat16), preferred_element_type=jnp.float32) + b1, 0.0)
    h = jnp.maximum(
        jnp.dot(h.astype(jnp.bfloat16), w2.astype(jnp.bfloat16),
                preferred_element_type=jnp.float32) + b2, 0.0)
    return (jnp.dot(h.astype(jnp.bfloat16), w3.astype(jnp.bfloat16),
                    preferred_element_type=jnp.float32) + b3)


if __name__ == "__main__":
    key = jax.random.PRNGKey(0)
    kx, kp = jax.random.split(key)

    B = 4
    x = jax.random.normal(kx, (B, 5, 8), jnp.float32)   # matches Linear(5*8, ...)
    params = init_params(kp)
    prepped = prepare_params(params)                    # one-time weight prep

    out = my_basis_function_forward(x, prepped)
    out = jax.block_until_ready(out)

    ref = _reference(x, params)
    assert out.shape == (B, OUT_FEATURES)
    assert jnp.allclose(out, ref, atol=1e-2, rtol=1e-2)

    print("KERNEL_OK")
</pallas_src>

<mosaic_0001>
module attributes {stable_mosaic.version = 11 : i64} {
  func.func @_mlp_kernel(%arg0: i32, %arg1: memref<8x40xf32, #tpu.memory_space<vmem>>, %arg2: memref<40x128xbf16, #tpu.memory_space<vmem>>, %arg3: memref<1x128xf32, #tpu.memory_space<vmem>>, %arg4: memref<128x128xbf16, #tpu.memory_space<vmem>>, %arg5: memref<1x128xf32, #tpu.memory_space<vmem>>, %arg6: memref<128x128xbf16, #tpu.memory_space<vmem>>, %arg7: memref<1x128xf32, #tpu.memory_space<vmem>>, %arg8: memref<8x10xf32, #tpu.memory_space<vmem>>) attributes {dimension_semantics = [#tpu.dimension_semantics<parallel>], iteration_bounds = array<i64: 1>, scalar_prefetch = 0 : i64, scratch_operands = 0 : i64, tpu.core_type = #tpu.core_type<tc>, window_params = [{transform_indices = @transform_0, window_bounds = array<i64: 8, 40>}, {pipeline_mode = #tpu.pipeline_mode<synchronous>, transform_indices = @transform_1, window_bounds = array<i64: 40, 128>}, {pipeline_mode = #tpu.pipeline_mode<synchronous>, transform_indices = @transform_2, window_bounds = array<i64: 1, 128>}, {pipeline_mode = #tpu.pipeline_mode<synchronous>, transform_indices = @transform_3, window_bounds = array<i64: 128, 128>}, {pipeline_mode = #tpu.pipeline_mode<synchronous>, transform_indices = @transform_4, window_bounds = array<i64: 1, 128>}, {pipeline_mode = #tpu.pipeline_mode<synchronous>, transform_indices = @transform_5, window_bounds = array<i64: 128, 128>}, {pipeline_mode = #tpu.pipeline_mode<synchronous>, transform_indices = @transform_6, window_bounds = array<i64: 1, 128>}, {transform_indices = @transform_7, window_bounds = array<i64: 8, 10>}]} {
    %c0 = arith.constant 0 : index
    %c0_0 = arith.constant 0 : index
    %0 = vector.load %arg1[%c0, %c0_0] : memref<8x40xf32, #tpu.memory_space<vmem>>, vector<8x40xf32>
    %1 = arith.truncf %0 : vector<8x40xf32> to vector<8x40xbf16>
    %c0_1 = arith.constant 0 : index
    %c0_2 = arith.constant 0 : index
    %2 = vector.load %arg2[%c0_1, %c0_2] : memref<40x128xbf16, #tpu.memory_space<vmem>>, vector<40x128xbf16>
    %cst = arith.constant dense<0.000000e+00> : vector<8x128xf32>
    %3 = tpu.matmul %1, %2, %cst {dimension_numbers = #tpu.dot_dimension_numbers<[1], [0], [0], [1], [0, 0, 1, 1], [], []>} : vector<8x40xbf16>, vector<40x128xbf16>, vector<8x128xf32> -> vector<8x128xf32>
    %c0_3 = arith.constant 0 : index
    %c0_4 = arith.constant 0 : index
    %4 = vector.load %arg3[%c0_3, %c0_4] : memref<1x128xf32, #tpu.memory_space<vmem>>, vector<1x128xf32>
    %5 = vector.broadcast %4 : vector<1x128xf32> to vector<8x128xf32>
    %6 = arith.addf %3, %5 : vector<8x128xf32>
    %cst_5 = arith.constant 0.000000e+00 : f32
    %7 = vector.broadcast %cst_5 : f32 to vector<8x128xf32>
    %8 = arith.maximumf %6, %7 : vector<8x128xf32>
    %9 = arith.truncf %8 : vector<8x128xf32> to vector<8x128xbf16>
    %c0_6 = arith.constant 0 : index
    %c0_7 = arith.constant 0 : index
    %10 = vector.load %arg4[%c0_6, %c0_7] : memref<128x128xbf16, #tpu.memory_space<vmem>>, vector<128x128xbf16>
    %cst_8 = arith.constant dense<0.000000e+00> : vector<8x128xf32>
    %11 = tpu.matmul %9, %10, %cst_8 {dimension_numbers = #tpu.dot_dimension_numbers<[1], [0], [0], [1], [0, 0, 1, 1], [], []>} : vector<8x128xbf16>, vector<128x128xbf16>, vector<8x128xf32> -> vector<8x128xf32>
    %c0_9 = arith.constant 0 : index
    %c0_10 = arith.constant 0 : index
    %12 = vector.load %arg5[%c0_9, %c0_10] : memref<1x128xf32, #tpu.memory_space<vmem>>, vector<1x128xf32>
    %13 = vector.broadcast %12 : vector<1x128xf32> to vector<8x128xf32>
    %14 = arith.addf %11, %13 : vector<8x128xf32>
    %cst_11 = arith.constant 0.000000e+00 : f32
    %15 = vector.broadcast %cst_11 : f32 to vector<8x128xf32>
    %16 = arith.maximumf %14, %15 : vector<8x128xf32>
    %17 = arith.truncf %16 : vector<8x128xf32> to vector<8x128xbf16>
    %c0_12 = arith.constant 0 : index
    %c0_13 = arith.constant 0 : index
    %18 = vector.load %arg6[%c0_12, %c0_13] : memref<128x128xbf16, #tpu.memory_space<vmem>>, vector<128x128xbf16>
    %cst_14 = arith.constant dense<0.000000e+00> : vector<8x128xf32>
    %19 = tpu.matmul %17, %18, %cst_14 {dimension_numbers = #tpu.dot_dimension_numbers<[1], [0], [0], [1], [0, 0, 1, 1], [], []>} : vector<8x128xbf16>, vector<128x128xbf16>, vector<8x128xf32> -> vector<8x128xf32>
    %c0_15 = arith.constant 0 : index
    %c0_16 = arith.constant 0 : index
    %20 = vector.load %arg7[%c0_15, %c0_16] : memref<1x128xf32, #tpu.memory_space<vmem>>, vector<1x128xf32>
    %21 = vector.broadcast %20 : vector<1x128xf32> to vector<8x128xf32>
    %22 = arith.addf %19, %21 : vector<8x128xf32>
    %23 = vector.extract_strided_slice %22 {offsets = [0, 0], sizes = [8, 10], strides = [1, 1]} : vector<8x128xf32> to vector<8x10xf32>
    %c0_17 = arith.constant 0 : index
    %c0_18 = arith.constant 0 : index
    %24 = vector.load %arg8[%c0_17, %c0_18] : memref<8x10xf32, #tpu.memory_space<vmem>>, vector<8x10xf32>
    tpu.vector_store %arg8[%c0_17, %c0_18], %23 {strides = array<i32>} : memref<8x10xf32, #tpu.memory_space<vmem>>, vector<8x10xf32>,
    return
  }
  func.func @transform_0(%arg0: i32) -> (i32, i32) {
    %c0_i32 = arith.constant 0 : i32
    %c0_i32_0 = arith.constant 0 : i32
    return %arg0, %c0_i32 : i32, i32
  }
  func.func @transform_1(%arg0: i32) -> (i32, i32) {
    %c0_i32 = arith.constant 0 : i32
    %c0_i32_0 = arith.constant 0 : i32
    %c0_i32_1 = arith.constant 0 : i32
    return %c0_i32, %c0_i32_0 : i32, i32
  }
  func.func @transform_2(%arg0: i32) -> (i32, i32) {
    %c0_i32 = arith.constant 0 : i32
    %c0_i32_0 = arith.constant 0 : i32
    %c0_i32_1 = arith.constant 0 : i32
    return %c0_i32, %c0_i32_0 : i32, i32
  }
  func.func @transform_3(%arg0: i32) -> (i32, i32) {
    %c0_i32 = arith.constant 0 : i32
    %c0_i32_0 = arith.constant 0 : i32
    %c0_i32_1 = arith.constant 0 : i32
    return %c0_i32, %c0_i32_0 : i32, i32
  }
  func.func @transform_4(%arg0: i32) -> (i32, i32) {
    %c0_i32 = arith.constant 0 : i32
    %c0_i32_0 = arith.constant 0 : i32
    %c0_i32_1 = arith.constant 0 : i32
    return %c0_i32, %c0_i32_0 : i32, i32
  }
  func.func @transform_5(%arg0: i32) -> (i32, i32) {
    %c0_i32 = arith.constant 0 : i32
    %c0_i32_0 = arith.constant 0 : i32
    %c0_i32_1 = arith.constant 0 : i32
    return %c0_i32, %c0_i32_0 : i32, i32
  }
  func.func @transform_6(%arg0: i32) -> (i32, i32) {
    %c0_i32 = arith.constant 0 : i32
    %c0_i32_0 = arith.constant 0 : i32
    %c0_i32_1 = arith.constant 0 : i32
    return %c0_i32, %c0_i32_0 : i32, i32
  }
  func.func @transform_7(%arg0: i32) -> (i32, i32) {
    %c0_i32 = arith.constant 0 : i32
    %c0_i32_0 = arith.constant 0 : i32
    return %arg0, %c0_i32 : i32, i32
  }
}

</mosaic_0001>

<bundles_post_ra>
// kernel: tpu_custom_call.1
= control target key start
LH: loop header
LB: loop body
LE: loop exit
PB: predicated region body
PF: predicated region fallthrough
CT: control target
= control target key end

     0   :  { %12 = vsyncpa [#allocation3], 0  ;;  %s623_s0 = inlined_call_operand.hbm [shape: f32[8,40], index: 0, kind: input, shape index: {}]   ;;  %s624_s1 = inlined_call_operand.hbm [shape: bf16[40,128], index: 1, kind: input, shape index: {}]   ;;  %s625_s2 = inlined_call_operand.vmem [shape: f32[1,128], index: 2, kind: input, shape index: {}]   ;;  %s626_s3 = inlined_call_operand.hbm [shape: bf16[128,128], index: 3, kind: input, shape index: {}]   ;;  %s627_s4 = inlined_call_operand.vmem [shape: f32[1,128], index: 4, kind: input, shape index: {}]   ;;  %s628_s5 = inlined_call_operand.hbm [shape: bf16[128,128], index: 5, kind: input, shape index: {}]   ;;  %s629_s6 = inlined_call_operand.vmem [shape: f32[1,128], index: 6, kind: input, shape index: {}]   ;;  %s630_s7 = inlined_call_operand.hbm [shape: f32[8,10], index: 7, kind: output, shape index: {}]  }
   0x1   :  { %13 = vsyncpa [#allocation6], 0 }
   0x2   :  { %14 = vsyncpa [#allocation9], 0  ;;  %s31_s26 = sshll.u32 %s624_s1, 4  ;;  %s32_s26 = int_to_ptr.hbm [resolvable:$true] %s31_s26 }
   0x3   :  { %15 = vsyncpa [#allocation4], 0  ;;  %s552_s27 = smov [#allocation5]   ;;  %s21_s8 = sshll.u32 %s623_s0, 4  ;;  %s22_s8 = int_to_ptr.hbm [resolvable:$true] %s21_s8 }
   0x4   :  { %s33_s28 = sshll.u32 %s552_s27, 4  ;;  %s553_s9 = smov 64   ;;  %s34_s28 = int_to_ptr.vmem [resolvable:$true] %s33_s28 }
   0x5   :  { %s554_s10 = smov 4   ;;  %s555_s11 = smov [#allocation2]  }
   0x6   :  { %39 = dma.hbm_to_vmem [thread:$0]  %s32_s26, 320, %s34_s28, [#allocation6], %s553_s9, %s553_s9, %s554_s10  }
   0x7   :  { %s23_s12 = sshll.u32 %s555_s11, 4  ;;  %s46_s15 = sshll.u32 %s626_s3, 4  ;;  %s24_s12 = int_to_ptr.vmem [resolvable:$true] %s23_s12  ;;  %s47_s15 = int_to_ptr.hbm [resolvable:$true] %s46_s15 }
   0x8   :  { %26 = dma.hbm_to_vmem [thread:$0]  %s22_s8, 128, %s24_s12, [#allocation3]  }
   0x9   :  { %s61_s17 = sshll.u32 %s628_s5, 4  ;;  %s556_s18 = smov [#allocation7]   ;;  %s62_s17 = int_to_ptr.hbm [resolvable:$true] %s61_s17 }
   0xa   :  { %s48_s19 = sshll.u32 %s556_s18, 4  ;;  %s557_s0 = smov [#allocation8]   ;;  %s49_s19 = int_to_ptr.vmem [resolvable:$true] %s48_s19 }
   0xb   :  { %54 = dma.hbm_to_vmem [thread:$0]  %s47_s15, 1024, %s49_s19, [#allocation6], %s553_s9, %s553_s9, %s554_s10  }
   0xc   :  { %s63_s20 = sshll.u32 %s557_s0, 4  ;;  %s64_s20 = int_to_ptr.vmem [resolvable:$true] %s63_s20 }
   0xd   :  { %69 = dma.hbm_to_vmem [thread:$0]  %s62_s17, 1024, %s64_s20, [#allocation9], %s553_s9, %s553_s9, %s554_s10  }
   0xe   :  { %544 = dma.done.wait [#allocation3], 128  }
   0xf   :  { %545 = vsyncadd [#allocation3], 4294967168 }
  0x10   :  { %546 = dma.done.wait [#allocation6], 1344  }
  0x11   :  { %547 = vsyncadd [#allocation6], 4294965952 }
  0x12   :  { %548 = dma.done.wait [#allocation9], 1024  }
  0x13   :  { %549 = vsyncadd [#allocation9], 4294966272  ;;  %v95_v0 = vld [vmem:[#allocation5 + $0x10] sm:$0xf]  ;;  %vm119_vm0 = vcmask 1043456   ;;  %v404_v4 = vld [vmem:[#allocation7 + $0x30] sm:$0xff] }
  0x14   :  { %v109_v1 = vunpack.c.l.b16 %v95_v0  ;;  %v405_v2 = vld [vmem:[#allocation7 + $0x38] sm:$0xff]  ;;  %v403_v7 = vld [vmem:[#allocation7 + $0x28] sm:$0xff]  ;;  %v402_v10 = vld [vmem:[#allocation7 + $0x20] sm:$0xff]  ;;  %vm115_vm1 = vcmask 326656   ;;  %s558_s24 = smov [#allocation10]   ;;  %s311_s28 = sshll.u32 %s630_s7, 4  ;;  %s312_s28 = int_to_ptr.hbm [resolvable:$true] %s311_s28 }
  0x15   :  { %206 = vmatpush.bf16.msra.mxu1 %v405_v2  ;;  %v397_v6 = vld [vmem:[#allocation5 + $0x8] sm:$0xff]  ;;  %v396_v8 = vld [vmem:[#allocation5] sm:$0xff]  ;;  %v89_v9 = vld [vmem:[#allocation2] sm:$0xff]  ;;  %s309_s25 = sshll.u32 %s558_s24, 4  ;;  %vm302_vm2 = vcmask 80896   ;;  %s310_s25 = int_to_ptr.vmem [resolvable:$true] %s309_s25 }
  0x16   :  { %v112_v3 = vpack.c.b16 %v109_v1, %v109_v1  ;;  %v90_v11 = vpack.c.bf16 %v89_v9, %v89_v9  ;;  %v401_v12 = vld [vmem:[#allocation7 + $0x18] sm:$0xff]  ;;  %v400_v13 = vld [vmem:[#allocation7 + $0x10] sm:$0xff]  ;;  %v399_v14 = vld [vmem:[#allocation7 + $0x8] sm:$0xff] }
  0x17   :  { %v398_v15 = vld [vmem:[#allocation7] sm:$0xff]  ;;  %v413_v16 = vld [vmem:[#allocation8 + $0x38] sm:$0xff]  ;;  %v412_v17 = vld [vmem:[#allocation8 + $0x30] sm:$0xff] }
  0x18   :  { %v121_v5 = vsel %vm119_vm0, %v112_v3, 0  ;;  %289 = vmatpush.bf16.msra.mxu2 %v413_v16  ;;  %v411_v18 = vld [vmem:[#allocation8 + $0x28] sm:$0xff]  ;;  %v410_v19 = vld [vmem:[#allocation8 + $0x20] sm:$0xff]  ;;  %v409_v20 = vld [vmem:[#allocation8 + $0x18] sm:$0xff] }
  0x19   :  { %128 = vmatpush.bf16.msra.mxu0 %v121_v5  ;;  %207 = vmatpush.bf16.msra.mxu1 %v404_v4  ;;  %v408_v21 = vld [vmem:[#allocation8 + $0x10] sm:$0xff]  ;;  %v421_v22 = vld [vmem:[%s625_s2] ss:$0 sm:$0xff]  ;;  %v407_v28 = vld [vmem:[#allocation8 + $0x8] sm:$0xff] }
  0x1a   :  { %v406_v29 = vld [vmem:[#allocation8] sm:$0xff] }
  0x1b   :  { %v422_v30 = vld [vmem:[%s627_s4] ss:$0 sm:$0xff] }
  0x1c   :  { %290 = vmatpush.bf16.msra.mxu2 %v412_v17  ;;  %v423_v36 = vld [vmem:[%s629_s6] ss:$0 sm:$0xff] }
  0x1d   :  { %129 = vmatpush.bf16.msra.mxu0 %v397_v6  ;;  %208 = vmatpush.bf16.msra.mxu1 %v403_v7 }
  0x20   :  { %291 = vmatpush.bf16.msra.mxu2 %v411_v18 }
  0x21   :  { %130 = vmatpush.bf16.msra.mxu0 %v396_v8  ;;  %209 = vmatpush.bf16.msra.mxu1 %v402_v10 }
  0x24   :  { %331 = vmatmul.msk.bf16.vlgmr.msra.gmra.mxu0 %vm115_vm1, %v90_v11  ;;  %292 = vmatpush.bf16.msra.mxu2 %v410_v19 }
  0x25   :  { %210 = vmatpush.bf16.msra.mxu1 %v401_v12 }
  0x28   :  { %293 = vmatpush.bf16.msra.mxu2 %v409_v20 }
  0x29   :  { %211 = vmatpush.bf16.msra.mxu1 %v400_v13 }
  0x2c   :  { %294 = vmatpush.bf16.msra.mxu2 %v408_v21 }
  0x2d   :  { %212 = vmatpush.bf16.msra.mxu1 %v399_v14 }
  0x30   :  { %295 = vmatpush.bf16.msra.mxu2 %v407_v28 }
  0x31   :  { %213 = vmatpush.bf16.msra.mxu1 %v398_v15 }
  0x34   :  { %296 = vmatpush.bf16.msra.mxu2 %v406_v29 }
  0xa1   :  { %v132_v23 = vpop.f32.mrf.mxu0 }
  0xa2   :  { %v133_v24 = vadd.f32 %v421_v22, %v132_v23 }
  0xa4   :  { %v136_v25 = vmax.f32 %v133_v24, 0.0 }
  0xa6   :  { %v137_v26 = vpack.c.bf16 %v136_v25, %v136_v25 }
  0xa8   :  { %214 = vmatmul.bf16.vlgmr.msra.gmra.mxu1 %v137_v26 }
  0xa9   :  { %v134_v27 = vpop.f32.mrf.mxu0 }
 0x125   :  { %v215_v31 = vpop.f32.mrf.mxu1 }
 0x126   :  { %v216_v32 = vadd.f32 %v422_v30, %v215_v31 }
 0x128   :  { %v219_v33 = vmax.f32 %v216_v32, 0.0 }
 0x12a   :  { %v220_v34 = vpack.c.bf16 %v219_v33, %v219_v33 }
 0x12c   :  { %297 = vmatmul.bf16.vlgmr.msra.gmra.mxu2 %v220_v34 }
 0x12d   :  { %v217_v35 = vpop.f32.mrf.mxu1 }
 0x1af   :  { %v298_v37 = vpop.f32.mrf.mxu2 }
 0x1b0   :  { %v299_v38 = vadd.f32 %v423_v36, %v298_v37 }
 0x1b2   :  { %303 = vst.msk [vmem:[#allocation10] sm:$0xff] %vm302_vm2, %v299_v38 }
 0x1b3   :  { %314 = dma.vmem_to_hbm [thread:$0]  %s310_s25, 128, %s312_s28, [#allocation4]  }
 0x1b7   :  { %v300_v39 = vpop.f32.mrf.mxu2 }
 0x1b8   :  { %550 = dma.done.wait [#allocation4], 128  }
 0x1b9   :  { %551 = vsyncadd [#allocation4], 4294967168 }
 0x1ba   :  { %319 = vsyncpa [#allocation3], 1 }
 0x1bb   :  { %320 = vsyncpa [#allocation6], 1 }
 0x1bc   :  { %321 = vsyncpa [#allocation9], 1 }
 0x1bd   :  { %322 = vsyncpa [#allocation4], 1 }

</bundles_post_ra>
